<compile_context>
chip_gen: v6e
topology: v6e:2x2x1
jax: 0.10.0
libtpu: 0.0.40
codegen_flags: <defaults>
</compile_context>

<pallas_src>
import functools

import jax
import jax.numpy as jnp
from jax.experimental import pallas as pl
from jax.experimental.pallas import tpu as pltpu

_MIB = 1024 * 1024
_LANE = 128


def _vmem_capacity_bytes():
    """Chip-aware VMEM capacity with a conservative (v7x-sized) fallback."""
    try:
        cap = getattr(pltpu.get_tpu_info(), "vmem_capacity_bytes", None)
        if cap:
            return int(cap)
    except Exception:
        pass
    return 64 * _MIB


# ---------------------------------------------------------------------------
# Fused single-pass kernel (small (C, S) slabs): pool + MLP + sigmoid + rescale
# ---------------------------------------------------------------------------
def _fused_kernel(x_ref, w1t_ref, b1_ref, w2_ref, b2_ref, o_ref, *, s_size):
    xv = x_ref[0].astype(jnp.float32)                          # (C, S)
    avg = jnp.sum(xv, axis=-1, keepdims=True) * jnp.float32(1.0 / s_size)   # (C, 1)
    mx = jnp.max(xv, axis=-1, keepdims=True)                   # (C, 1)

    w1t = w1t_ref[...]                                         # (C, Cr) == w1.T
    b1 = b1_ref[...]                                           # (1, Cr)
    w2 = w2_ref[...]                                           # (C, Cr)  (PyTorch layout)
    b2 = b2_ref[...]                                           # (C, 1)

    def mlp(y):                                                # y: (C, 1)
        # layer 1: h[r] = sum_c w1[r, c] * y[c] + b1[r]   -> lane-oriented (1, Cr)
        h = jnp.maximum(jnp.sum(y * w1t, axis=0, keepdims=True) + b1, 0.0)
        # layer 2: o[c] = sum_r w2[c, r] * h[r] + b2[c]   -> sublane-oriented (C, 1)
        return jnp.sum(h * w2, axis=1, keepdims=True) + b2

    scale = jax.nn.sigmoid(mlp(avg) + mlp(mx))                 # (C, 1)
    o_ref[0] = (xv * scale).astype(o_ref.dtype)


# ---------------------------------------------------------------------------
# Two-pass kernels (large slabs)
# ---------------------------------------------------------------------------
def _reduce_kernel(x_ref, sum_ref, max_ref, *, s_valid, tile_s, needs_mask):
    """Accumulate per-channel sum / max across the tiled spatial axis."""
    s_idx = pl.program_id(1)
    xv = x_ref[0].astype(jnp.float32)                          # (C, TS)

    if needs_mask:
        # Partial last block: out-of-bounds lanes contain unspecified data.
        lane = jax.lax.broadcasted_iota(jnp.int32, xv.shape, 1)
        valid = (s_idx * tile_s + lane) < s_valid
        x_sum_src = jnp.where(valid, xv, 0.0)
        x_max_src = jnp.where(valid, xv, -jnp.inf)
    else:
        x_sum_src = xv
        x_max_src = xv

    part_sum = jnp.sum(x_sum_src, axis=-1, keepdims=True)      # (C, 1)
    part_max = jnp.max(x_max_src, axis=-1, keepdims=True)      # (C, 1)

    @pl.when(s_idx == 0)
    def _():
        sum_ref[0] = part_sum
        max_ref[0] = part_max

    @pl.when(s_idx != 0)
    def _():
        sum_ref[0] = sum_ref[0] + part_sum
        max_ref[0] = jnp.maximum(max_ref[0], part_max)


def _scale_kernel(x_ref, scale_ref, o_ref):
    """out = x * per-channel scale (broadcast over the lane-dense spatial tile)."""
    o_ref[0] = x_ref[0] * scale_ref[0]                         # (C, TS) * (C, 1)


# ---------------------------------------------------------------------------
# Wrapper
# ---------------------------------------------------------------------------
def channel_attention_gate(x, w1, b1, w2, b2, *, allow_fused=True):
    """x: (B, C, D, H, W).  Weights in PyTorch nn.Linear layout:
       w1: (C//r, C), b1: (C//r,), w2: (C, C//r), b2: (C,)."""
    B, C, D, H, W = x.shape
    S = D * H * W
    Cr = w1.shape[0]
    itemsize = jnp.dtype(x.dtype).itemsize
    cap = _vmem_capacity_bytes()

    x2 = x.reshape(B, C, S)

    # ------------------ fused single-pass path ------------------
    slab = C * S * itemsize
    fused_budget = max(min(cap // 2 - 8 * _MIB, 48 * _MIB), 8 * _MIB)
    if allow_fused and 4 * slab <= fused_budget:
        vmem_fused = int(min(max(32 * _MIB, 4 * slab + 8 * _MIB),
                             max(cap - 8 * _MIB, 32 * _MIB)))
        w1t = w1.T.astype(jnp.float32)                         # (C, Cr)
        b1r = b1.reshape(1, Cr).astype(jnp.float32)
        w2m = w2.astype(jnp.float32)                           # (C, Cr)
        b2c = b2.reshape(C, 1).astype(jnp.float32)
        out2 = pl.pallas_call(
            functools.partial(_fused_kernel, s_size=S),
            out_shape=jax.ShapeDtypeStruct((B, C, S), x.dtype),
            grid=(B,),
            in_specs=[
                pl.BlockSpec((1, C, S), lambda b: (b, 0, 0)),
                pl.BlockSpec((C, Cr), lambda b: (0, 0)),
                pl.BlockSpec((1, Cr), lambda b: (0, 0)),
                pl.BlockSpec((C, Cr), lambda b: (0, 0)),
                pl.BlockSpec((C, 1), lambda b: (0, 0)),
            ],
            out_specs=pl.BlockSpec((1, C, S), lambda b: (b, 0, 0)),
            compiler_params=pltpu.CompilerParams(
                dimension_semantics=("parallel",),
                vmem_limit_bytes=vmem_fused),
            cost_estimate=pl.CostEstimate(
                flops=4 * B * C * S, transcendentals=B * C,
                bytes_accessed=2 * B * C * S * itemsize),
        )(x2, w1t, b1r, w2m, b2c)
        return out2.reshape(B, C, D, H, W)

    # ------------------ two-pass path (large slabs) ------------------
    # Lane-dense spatial tile sized by block bytes (~2 MiB), never padded.
    tp_budget = min(cap // 2, 32 * _MIB)
    block_bytes_target = min(2 * _MIB, tp_budget // 5)
    ts = max((block_bytes_target // (C * itemsize)) // _LANE, 1) * _LANE
    s_ceil = pl.cdiv(S, _LANE) * _LANE
    ts = min(ts, s_ceil)
    n_tiles = pl.cdiv(S, ts)
    needs_mask = (S % ts) != 0
    block_bytes = C * ts * itemsize
    vmem_tp = int(min(max(32 * _MIB, 5 * block_bytes + 2 * _MIB),
                      max(cap - 8 * _MIB, 32 * _MIB)))

    # ---- pass 1: per-(b, c) sum / max over tiled spatial axis ----
    reduce_fn = functools.partial(
        _reduce_kernel, s_valid=S, tile_s=ts, needs_mask=needs_mask)
    sums, maxs = pl.pallas_call(
        reduce_fn,
        out_shape=(
            jax.ShapeDtypeStruct((B, C, 1), jnp.float32),
            jax.ShapeDtypeStruct((B, C, 1), jnp.float32),
        ),
        grid=(B, n_tiles),
        in_specs=[pl.BlockSpec((1, C, ts), lambda b, s: (b, 0, s))],
        out_specs=(
            pl.BlockSpec((1, C, 1), lambda b, s: (b, 0, 0)),
            pl.BlockSpec((1, C, 1), lambda b, s: (b, 0, 0)),
        ),
        compiler_params=pltpu.CompilerParams(
            dimension_semantics=("parallel", "arbitrary"),
            vmem_limit_bytes=vmem_tp),
        cost_estimate=pl.CostEstimate(
            flops=2 * B * C * S, transcendentals=0,
            bytes_accessed=B * C * S * itemsize + 2 * B * C * 4),
    )(x2)

    # ---- tiny shared MLP + sigmoid on (B, C) in plain XLA ----
    avg = sums[:, :, 0] / jnp.float32(S)                       # (B, C)
    mx = maxs[:, :, 0]                                         # (B, C)

    def mlp(y):
        h = jnp.maximum(y @ w1.T.astype(jnp.float32) + b1, 0.0)
        return h @ w2.T.astype(jnp.float32) + b2

    scale = jax.nn.sigmoid(mlp(avg) + mlp(mx)).astype(x.dtype) # (B, C)
    scale3 = scale.reshape(B, C, 1)

    # ---- pass 2: out = x * scale (partial last block clipped on writeback) ----
    out2 = pl.pallas_call(
        _scale_kernel,
        out_shape=jax.ShapeDtypeStruct((B, C, S), x.dtype),
        grid=(B, n_tiles),
        in_specs=[
            pl.BlockSpec((1, C, ts), lambda b, s: (b, 0, s)),
            pl.BlockSpec((1, C, 1), lambda b, s: (b, 0, 0)),
        ],
        out_specs=pl.BlockSpec((1, C, ts), lambda b, s: (b, 0, s)),
        compiler_params=pltpu.CompilerParams(
            dimension_semantics=("parallel", "parallel"),
            vmem_limit_bytes=vmem_tp),
        cost_estimate=pl.CostEstimate(
            flops=B * C * S, transcendentals=0,
            bytes_accessed=2 * B * C * S * itemsize + B * C * itemsize),
    )(x2, scale3)

    return out2.reshape(B, C, D, H, W)


# ---------------------------------------------------------------------------
# Reference + tests
# ---------------------------------------------------------------------------
def _reference(x, w1, b1, w2, b2):
    B, C = x.shape[:2]
    xf = x.reshape(B, C, -1)
    avg = xf.mean(axis=-1)                                     # (B, C)
    mx = xf.max(axis=-1)                                       # (B, C)

    def mlp(y):
        h = jnp.maximum(y @ w1.T + b1, 0.0)
        return h @ w2.T + b2

    scale = jax.nn.sigmoid(mlp(avg) + mlp(mx))                 # (B, C)
    return x * scale.reshape(B, C, 1, 1, 1)


def _run_case(key, B, C, D, H, W, reduction, allow_fused=True):
    Cr = max(C // reduction, 1)
    k_x, k_w1, k_b1, k_w2, k_b2 = jax.random.split(key, 5)
    x = jax.random.normal(k_x, (B, C, D, H, W), dtype=jnp.float32)

    bound1 = 1.0 / (C ** 0.5)
    bound2 = 1.0 / (Cr ** 0.5)
    w1 = jax.random.uniform(k_w1, (Cr, C), jnp.float32, -bound1, bound1)
    b1 = jax.random.uniform(k_b1, (Cr,), jnp.float32, -bound1, bound1)
    w2 = jax.random.uniform(k_w2, (C, Cr), jnp.float32, -bound2, bound2)
    b2 = jax.random.uniform(k_b2, (C,), jnp.float32, -bound2, bound2)

    out = jax.block_until_ready(
        channel_attention_gate(x, w1, b1, w2, b2, allow_fused=allow_fused))
    ref = _reference(x, w1, b1, w2, b2)
    assert out.shape == x.shape
    assert jnp.allclose(out, ref, atol=1e-5, rtol=1e-5), "mismatch vs reference"


if __name__ == "__main__":
    key = jax.random.PRNGKey(0)
    k0, k1, k2, k3 = jax.random.split(key, 4)

    # Fused single-pass path, lane-aligned spatial size (S = 256).
    _run_case(k0, B=2, C=32, D=4, H=8, W=8, reduction=16)
    # Fused path, ragged spatial size (S = 105).
    _run_case(k1, B=2, C=32, D=3, H=5, W=7, reduction=16)
    # Two-pass path forced: exercises masked partial-block reduce + clipped writeback.
    _run_case(k2, B=2, C=32, D=3, H=5, W=7, reduction=16, allow_fused=False)
    # Two-pass path, lane-aligned tiles.
    _run_case(k3, B=2, C=32, D=4, H=8, W=8, reduction=16, allow_fused=False)

    print("KERNEL_OK")
</pallas_src>

<mosaic_0001>
module attributes {stable_mosaic.version = 11 : i64} {
  func.func @_fused_kernel(%arg0: i32, %arg1: memref<1x32x256xf32, #tpu.memory_space<vmem>>, %arg2: memref<32x2xf32, #tpu.memory_space<vmem>>, %arg3: memref<1x2xf32, #tpu.memory_space<vmem>>, %arg4: memref<32x2xf32, #tpu.memory_space<vmem>>, %arg5: memref<32x1xf32, #tpu.memory_space<vmem>>, %arg6: memref<1x32x256xf32, #tpu.memory_space<vmem>>) attributes {dimension_semantics = [#tpu.dimension_semantics<parallel>], iteration_bounds = array<i64: 2>, scalar_prefetch = 0 : i64, scratch_operands = 0 : i64, tpu.core_type = #tpu.core_type<tc>, window_params = [{transform_indices = @transform_0, window_bounds = array<i64: 1, 32, 256>}, {pipeline_mode = #tpu.pipeline_mode<synchronous>, transform_indices = @transform_1, window_bounds = array<i64: 32, 2>}, {pipeline_mode = #tpu.pipeline_mode<synchronous>, transform_indices = @transform_2, window_bounds = array<i64: 1, 2>}, {pipeline_mode = #tpu.pipeline_mode<synchronous>, transform_indices = @transform_3, window_bounds = array<i64: 32, 2>}, {pipeline_mode = #tpu.pipeline_mode<synchronous>, transform_indices = @transform_4, window_bounds = array<i64: 32, 1>}, {transform_indices = @transform_5, window_bounds = array<i64: 1, 32, 256>}]} {
    %c0 = arith.constant 0 : index
    %c0_0 = arith.constant 0 : index
    %c0_1 = arith.constant 0 : index
    %0 = vector.load %arg1[%c0, %c0_0, %c0_1] : memref<1x32x256xf32, #tpu.memory_space<vmem>>, vector<1x32x256xf32>
    %1 = vector.shape_cast %0 : vector<1x32x256xf32> to vector<32x256xf32>
    %cst = arith.constant dense<0.000000e+00> : vector<32xf32>
    %2 = vector.multi_reduction <add>, %1, %cst [1] : vector<32x256xf32> to vector<32xf32>
    %3 = vector.shape_cast %2 : vector<32xf32> to vector<32x1xf32>
    %cst_2 = arith.constant 3.906250e-03 : f32
    %4 = vector.broadcast %cst_2 : f32 to vector<32x1xf32>
    %5 = arith.mulf %3, %4 : vector<32x1xf32>
    %cst_3 = arith.constant dense<0xFF800000> : vector<32xf32>
    %6 = vector.multi_reduction <maximumf>, %1, %cst_3 [1] : vector<32x256xf32> to vector<32xf32>
    %7 = vector.shape_cast %6 : vector<32xf32> to vector<32x1xf32>
    %c0_4 = arith.constant 0 : index
    %c0_5 = arith.constant 0 : index
    %8 = vector.load %arg2[%c0_4, %c0_5] : memref<32x2xf32, #tpu.memory_space<vmem>>, vector<32x2xf32>
    %c0_6 = arith.constant 0 : index
    %c0_7 = arith.constant 0 : index
    %9 = vector.load %arg3[%c0_6, %c0_7] : memref<1x2xf32, #tpu.memory_space<vmem>>, vector<1x2xf32>
    %c0_8 = arith.constant 0 : index
    %c0_9 = arith.constant 0 : index
    %10 = vector.load %arg4[%c0_8, %c0_9] : memref<32x2xf32, #tpu.memory_space<vmem>>, vector<32x2xf32>
    %c0_10 = arith.constant 0 : index
    %c0_11 = arith.constant 0 : index
    %11 = vector.load %arg5[%c0_10, %c0_11] : memref<32x1xf32, #tpu.memory_space<vmem>>, vector<32x1xf32>
    %12 = vector.broadcast %5 : vector<32x1xf32> to vector<32x2xf32>
    %13 = arith.mulf %12, %8 : vector<32x2xf32>
    %cst_12 = arith.constant dense<0.000000e+00> : vector<2xf32>
    %14 = vector.multi_reduction <add>, %13, %cst_12 [0] : vector<32x2xf32> to vector<2xf32>
    %15 = vector.shape_cast %14 : vector<2xf32> to vector<1x2xf32>
    %16 = arith.addf %15, %9 : vector<1x2xf32>
    %cst_13 = arith.constant 0.000000e+00 : f32
    %17 = vector.broadcast %cst_13 : f32 to vector<1x2xf32>
    %18 = arith.maximumf %16, %17 : vector<1x2xf32>
    %19 = vector.broadcast %18 : vector<1x2xf32> to vector<32x2xf32>
    %20 = arith.mulf %19, %10 : vector<32x2xf32>
    %cst_14 = arith.constant dense<0.000000e+00> : vector<32xf32>
    %21 = vector.multi_reduction <add>, %20, %cst_14 [1] : vector<32x2xf32> to vector<32xf32>
    %22 = vector.shape_cast %21 : vector<32xf32> to vector<32x1xf32>
    %23 = arith.addf %22, %11 : vector<32x1xf32>
    %24 = vector.broadcast %7 : vector<32x1xf32> to vector<32x2xf32>
    %25 = arith.mulf %24, %8 : vector<32x2xf32>
    %cst_15 = arith.constant dense<0.000000e+00> : vector<2xf32>
    %26 = vector.multi_reduction <add>, %25, %cst_15 [0] : vector<32x2xf32> to vector<2xf32>
    %27 = vector.shape_cast %26 : vector<2xf32> to vector<1x2xf32>
    %28 = arith.addf %27, %9 : vector<1x2xf32>
    %cst_16 = arith.constant 0.000000e+00 : f32
    %29 = vector.broadcast %cst_16 : f32 to vector<1x2xf32>
    %30 = arith.maximumf %28, %29 : vector<1x2xf32>
    %31 = vector.broadcast %30 : vector<1x2xf32> to vector<32x2xf32>
    %32 = arith.mulf %31, %10 : vector<32x2xf32>
    %cst_17 = arith.constant dense<0.000000e+00> : vector<32xf32>
    %33 = vector.multi_reduction <add>, %32, %cst_17 [1] : vector<32x2xf32> to vector<32xf32>
    %34 = vector.shape_cast %33 : vector<32xf32> to vector<32x1xf32>
    %35 = arith.addf %34, %11 : vector<32x1xf32>
    %36 = arith.addf %23, %35 : vector<32x1xf32>
    %37 = arith.negf %36 : vector<32x1xf32>
    %38 = math.exp %37 : vector<32x1xf32>
    %cst_18 = arith.constant 1.000000e+00 : f32
    %39 = vector.broadcast %cst_18 : f32 to vector<32x1xf32>
    %40 = arith.addf %39, %38 : vector<32x1xf32>
    %41 = arith.divf %39, %40 : vector<32x1xf32>
    %42 = vector.broadcast %41 : vector<32x1xf32> to vector<32x256xf32>
    %43 = arith.mulf %1, %42 : vector<32x256xf32>
    %c0_19 = arith.constant 0 : index
    %c0_20 = arith.constant 0 : index
    %c0_21 = arith.constant 0 : index
    %44 = vector.load %arg6[%c0_19, %c0_20, %c0_21] : memref<1x32x256xf32, #tpu.memory_space<vmem>>, vector<1x32x256xf32>
    %45 = vector.shape_cast %44 : vector<1x32x256xf32> to vector<32x256xf32>
    %46 = vector.shape_cast %43 : vector<32x256xf32> to vector<1x32x256xf32>
    tpu.vector_store %arg6[%c0_19, %c0_20, %c0_21], %46 {strides = array<i32>} : memref<1x32x256xf32, #tpu.memory_space<vmem>>, vector<1x32x256xf32>,
    return
  }
  func.func @transform_0(%arg0: i32) -> (i32, i32, i32) {
    %c0_i32 = arith.constant 0 : i32
    %c0_i32_0 = arith.constant 0 : i32
    %c0_i32_1 = arith.constant 0 : i32
    return %arg0, %c0_i32, %c0_i32_0 : i32, i32, i32
  }
  func.func @transform_1(%arg0: i32) -> (i32, i32) {
    %c0_i32 = arith.constant 0 : i32
    %c0_i32_0 = arith.constant 0 : i32
    %c0_i32_1 = arith.constant 0 : i32
    return %c0_i32, %c0_i32_0 : i32, i32
  }
  func.func @transform_2(%arg0: i32) -> (i32, i32) {
    %c0_i32 = arith.constant 0 : i32
    %c0_i32_0 = arith.constant 0 : i32
    %c0_i32_1 = arith.constant 0 : i32
    return %c0_i32, %c0_i32_0 : i32, i32
  }
  func.func @transform_3(%arg0: i32) -> (i32, i32) {
    %c0_i32 = arith.constant 0 : i32
    %c0_i32_0 = arith.constant 0 : i32
    %c0_i32_1 = arith.constant 0 : i32
    return %c0_i32, %c0_i32_0 : i32, i32
  }
  func.func @transform_4(%arg0: i32) -> (i32, i32) {
    %c0_i32 = arith.constant 0 : i32
    %c0_i32_0 = arith.constant 0 : i32
    %c0_i32_1 = arith.constant 0 : i32
    return %c0_i32, %c0_i32_0 : i32, i32
  }
  func.func @transform_5(%arg0: i32) -> (i32, i32, i32) {
    %c0_i32 = arith.constant 0 : i32
    %c0_i32_0 = arith.constant 0 : i32
    %c0_i32_1 = arith.constant 0 : i32
    return %arg0, %c0_i32, %c0_i32_0 : i32, i32, i32
  }
}

</mosaic_0001>

<bundles_post_ra>
// kernel: tpu_custom_call.1
= control target key start
LH: loop header
LB: loop body
LE: loop exit
PB: predicated region body
PF: predicated region fallthrough
CT: control target
= control target key end

     0   :  { %10 = vsyncpa [#allocation3], 0  ;;  %s1003_s0 = inlined_call_operand.hbm [shape: f32[2,32,256], index: 0, kind: input, shape index: {}]   ;;  %s1004_s1 = inlined_call_operand.vmem [shape: f32[32,2], index: 1, kind: input, shape index: {}]   ;;  %s1005_s2 = inlined_call_operand.vmem [shape: f32[1,2], index: 2, kind: input, shape index: {}]   ;;  %s1006_s3 = inlined_call_operand.vmem [shape: f32[32,2], index: 3, kind: input, shape index: {}]   ;;  %s1007_s4 = inlined_call_operand.vmem [shape: f32[32,1], index: 4, kind: input, shape index: {}]   ;;  %s1008_s5 = inlined_call_operand.hbm [shape: f32[2,32,256], index: 5, kind: output, shape index: {}]  }
   0x1   :  { %12 = vsyncpa [#allocation3 + $0x1], 0 }
   0x2   :  { %13 = vsyncpa [#allocation4], 0 }
   0x3   :  { %15 = vsyncpa [#allocation4 + $0x1], 0  ;;  %s750_s18 = smov 0   ;;  %s752_s19 = smov 0  }
   0x4   :  { %s754_s20 = smov 0   ;;  %s756_s21 = smov 0  }
   0x5 LB: > { %s771_s22 = sadd.s32 4294967295, %s711_s21   ;;  %s530_s23 = sadd.s32 4294967294, %s711_s21   ;;  %s711_s21 = sphi %s756_s21, %s1023_s21   ;;  %s707_s20 = sphi %s754_s20, %s1022_s20   ;;  %s703_s19 = sphi %s752_s19, %s1021_s19   ;;  %s699_s18 = sphi %s750_s18, %s1020_s18  }
   0x6   : > { %s775_s24 = sadd.s32 1, %s711_s21   ;;  %s28_s25 = sadd.s32 1, %s707_s20 }
   0x7   : > { %s25_s26 = ssub.s32 %s711_s21, %s775_s24  ;;  %p35_p0 = scmp.ne.s32.totalorder %s707_s20, %s703_s19 }
   0x8   : > { %p26_p1 = scmp.eq.s32.totalorder %s25_s26, 0  ;;  %p36_p2 = scmp.eq.s32.totalorder %s711_s21, 0 }
   0x9   : > { %p41_p3 = scmp.ne.s32.totalorder %s703_s19, %s699_s18  ;;  %p42_p4 = scmp.eq.s32.totalorder %s771_s22, 0 }
   0xa   : > { %s787_s27 = scalar_select %p26_p1, %s707_s20, %s28_s25  }
   0xb   : > { %p789_p5 = por %p36_p2, %p35_p0  ;;  %p793_p6 = por %p42_p4, %p41_p3 }
   0xc   : > { %p149_p7 = scmp.eq.s32.totalorder %s771_s22, 1  ;;  %p155_p8 = scmp.eq.s32.totalorder %s530_s23, 1 }
   0xd   : > { %s1012_s29 = scalar_select %p793_p6, 1, 0 }
   0xe   : > { %p562_p10 = scmp.lt.s32.totalorder %s711_s21, 2  ;;  %p800_p11 = por %p149_p7, %p35_p0 }
   0xf   : > { %p804_p12 = por %p155_p8, %p41_p3  ;;  %s187_s7 = sand.u32 1, %s707_s20  }
  0x10   : > { %s1013_s30 = scalar_select %p800_p11, 1, 0 }
  0x11   : > { %s1014_s6 = scalar_select %p804_p12, 1, 0 }
  0x12   : > { %s548_s8 = sshll.u32 %s711_s21, 10  ;;  %s533_s9 = sshll.u32 %s187_s7, 6 }
  0x13   : > { %s813_s12 = scalar_lea.hbm %s1003_s0, %s548_s8  ;;  %s191_s13 = scalar_lea.vmem [#allocation2], %s533_s9 }
  0x14   : > { %s198_s14 = sshll.u32 %s191_s13, 4  ;;  %p817_p13 = pnand %p562_p10, %p789_p5  ;;  %s821_s14 = int_to_ptr.vmem [resolvable:$true] %s198_s14 }
  0x15   : > { %s823_s16 = scalar_lea.sflag [#allocation3], %s187_s7  ;;  %s619_s17 = scalar_lea.hbm %s813_s12, 1024 }
  0x16   : > { %p620_p0 = scmp.ne.s32.totalorder %s813_s12, %s619_s17  ;;  %p621_p1 = pneg %p817_p13 }
  0x17   : > { %s624_s26 = scalar_lea.hbm %s1003_s0, 2048  ;;  %p625_p4 = scmp.lt.s32.totalorder %s813_s12, %s1003_s0 }
  0x18   : > { %p622_p2 = pnand %p621_p1, %p620_p0  ;;  %p626_p5 = scmp.lt.s32.totalorder %s624_s26, %s619_s17 }
  0x1a   : > { %p623_p3 = pneg %p622_p2  ;;  %p627_p7 = por %p626_p5, %p625_p4 }
  0x1c   : > { %p628_p8 = pnand %p627_p7, %p623_p3 }
  0x1e   : > { %631 = shalt.err (!%p628_p8)
}
  0x1f   : > { %s632_s7 = scalar_lea.vmem %s821_s14, 1024  ;;  %s713_s9 = smov [#allocation2]  }
  0x20   : > { %p633_p10 = scmp.ne.s32.totalorder %s821_s14, %s632_s7  ;;  %s637_s10 = sshll.u32 %s713_s9, 4  ;;  %s638_s10 = int_to_ptr.vmem [resolvable:$false] %s637_s10 }
  0x21   : > { %s639_s11 = scalar_lea.vmem %s638_s10, 2048  ;;  %p640_p2 = scmp.lt.s32.totalorder %s821_s14, %s638_s10 }
  0x22   : > { %p635_p9 = pnand %p633_p10, %p621_p1  ;;  %p641_p12 = scmp.lt.s32.totalorder %s639_s11, %s632_s7 }
  0x24   : > { %p636_p0 = pneg %p635_p9  ;;  %p642_p11 = por %p641_p12, %p640_p2 }
  0x26   : > { %p643_p6 = pnand %p642_p11, %p636_p0 }
  0x28   : > { %646 = shalt.err (!%p643_p6)
}
  0x29   : > { %s714_s13 = smov 256   ;;  %s715_s17 = smov 16  }
  0x2a   : > { %557 = dma.hbm_to_vmem [thread:$0]  (!%p817_p13), %s813_s12, 1024, %s821_s14, %s823_s16, %s714_s13, %s714_s13, %s715_s17  }
  0x2b   : > { %p536_p9 = scmp.ge.s32.totalorder %s711_s21, 1  ;;  %p206_p1 = scmp.lt.s32.totalorder %s711_s21, 3 }
  0x2d   : > { %p207_p3 = pnand %p536_p9, %p206_p1 }
  0x2e   : > { %s847_s23 = sand.u32 (!%p207_p3), 1, %s703_s19   ;;  %p1016_p6 = scmp.ne.s32.totalorder (!%p207_p3), %s1012_s29, 0 }
  0x2f   : > { %210 = sbr.rel (%p207_p3) target bundleno = 566 (0x236), region = 40  ;;  %s537_s25 = sshll.u32 (!%p207_p3), %s847_s23, 6 }
  0x30   : > { %s213_s26 = scalar_lea.sflag (!%p207_p3), [#allocation3], %s847_s23  ;;  %s216_s28 = scalar_lea.vmem (!%p207_p3), [#allocation2], %s537_s25 }
  0x34   : > { %690 = dma.done.wait (%p1016_p6), %s213_s26, 1024  }
  0x35   : > { %692 = vsyncadd (%p1016_p6), %s213_s26, 4294966272  ;;  %v857_v0 = vld [vmem:[%s216_s28 + $0x20] sm:$0xff]  ;;  %v859_v1 = vld [vmem:[%s216_s28 + $0x28] sm:$0xff]  ;;  %vm296_vm0 = vcmask 15360   ;;  %v312_v62 = vlaneseq  ;;  %s242_s26 = scalar_lea.vmem [#allocation5], %s537_s25  ;;  %s549_s29 = sshll.u32 %s771_s22, 10 }
  0x36   : > { %v861_v2 = vld [vmem:[%s216_s28] sm:$0xff]  ;;  %v257_v3 = vadd.f32 %v859_v1, %v857_v0  ;;  %v865_v4 = vld [vmem:[%s216_s28 + $0x8] sm:$0xff]  ;;  %v867_v5 = vld [vmem:[%s216_s28 + $0x10] sm:$0xff]  ;;  %v273_v15 = vmax.f32 %v857_v0, %v859_v1  ;;  %s958_s14 = scalar_lea.hbm %s1008_s5, %s549_s29  ;;  %s444_s22 = scalar_lea.sflag [#allocation4], %s847_s23 }
  0x37   : > { %v869_v6 = vld [vmem:[%s216_s28 + $0x18] sm:$0xff]  ;;  %v251_v7 = vadd.f32 %v865_v4, %v861_v2  ;;  %v267_v8 = vmax.f32 %v861_v2, %v865_v4  ;;  %v877_v10 = vld [vmem:[%s216_s28 + $0x30] sm:$0xff]  ;;  %v279_v19 = vld [vmem:[%s1004_s1] sm:$0xff]  ;;  %p1017_p12 = scmp.ne.s32.totalorder %s1013_s30, 0  ;;  %s717_s16 = smov [#allocation5]  }
  0x38   : > { %258 = vadd.xlane.f32.xlu1 %v257_v3  ;;  %v254_v9 = vadd.f32 %v869_v6, %v867_v5  ;;  %v879_v11 = vld [vmem:[%s216_s28 + $0x38] sm:$0xff]  ;;  %v270_v13 = vmax.f32 %v867_v5, %v869_v6  ;;  %v280_v23 = vld [vmem:[%s1004_s1 + $0x8] sm:$0xff]  ;;  %v281_v24 = vld [vmem:[%s1004_s1 + $0x10] sm:$0xff]  ;;  %s457_s28 = sshll.u32 %s242_s26, 4  ;;  %s651_s8 = sshll.u32 %s717_s16, 4  ;;  %s953_s28 = int_to_ptr.vmem [resolvable:$true] %s457_s28  ;;  %s652_s8 = int_to_ptr.vmem [resolvable:$false] %s651_s8 }
  0x39   : > { %252 = vadd.xlane.f32.xlu0 %v251_v7  ;;  %v260_v12 = vadd.f32 %v879_v11, %v877_v10  ;;  %v276_v14 = vmax.f32 %v877_v10, %v879_v11  ;;  %v282_v30 = vld [vmem:[%s1004_s1 + $0x18] sm:$0xff]  ;;  %v283_v63 = vld [vmem:[%s1005_s2] sm:$0x1]  ;;  %s647_s15 = scalar_lea.vmem %s953_s28, 1024  ;;  %s653_s7 = scalar_lea.vmem %s652_s8, 2048 }
  0x3a   : > { %p648_p11 = scmp.ne.s32.totalorder %s953_s28, %s647_s15  ;;  %p654_p5 = scmp.lt.s32.totalorder %s953_s28, %s652_s8 }
  0x3b   : > { %p655_p7 = scmp.lt.s32.totalorder %s653_s7, %s647_s15 }
  0x3c   : > { %268 = vmax.xlane.f32.xlu1 %v267_v8  ;;  %p649_p13 = pnand %p648_p11, %p1017_p12 }
  0x3d   : > { %255 = vadd.xlane.f32.xlu0 %v254_v9  ;;  %v313_v9 = vshrl.u32 %v312_v62, 7  ;;  %p656_p8 = por %p655_p7, %p654_p5 }
  0x3e   : > { %p650_p4 = pneg %p649_p13 }
  0x40   : > { %261 = vadd.xlane.f32.xlu1 %v260_v12  ;;  %p657_p10 = pnand %p656_p8, %p650_p4 }
  0x41   : > { %271 = vmax.xlane.f32.xlu0 %v270_v13 }
  0x44   : > { %277 = vmax.xlane.f32.xlu1 %v276_v14 }
  0x45   : > { %274 = vmax.xlane.f32.xlu0 %v273_v15  ;;  %v314_v15 = vsub.s32 0, %v313_v9 }
  0xc1   : > { %v259_v16 = vpop.xlane.xlu1 %258 }
  0xc2   : > { %v253_v17 = vpop.xlane.xlu0 %252  ;;  %v265_v20 = vmul.f32 0.00390625, %v259_v16 }
  0xc3   : > { %v263_v18 = vmul.f32 0.00390625, %v253_v17 }
  0xc4   : > { %v294_v29 = vmul.f32 %v281_v24, %v265_v20  ;;  %v285_v20 = vld [vmem:[%s1006_s3 + $0x8] sm:$0xff] }
  0xc5   : > { %v269_v21 = vpop.xlane.xlu1 %268  ;;  %v292_v25 = vmul.f32 %v279_v19, %v263_v18 }
  0xc6   : > { %v256_v22 = vpop.xlane.xlu0 %255  ;;  %v336_v34 = vmul.f32 %v279_v19, %v269_v21  ;;  %v300_v40 = vsel %vm296_vm0, %v294_v29, 0.0  ;;  %v284_v21 = vld [vmem:[%s1006_s3] sm:$0xff]  ;;  %v286_v29 = vld [vmem:[%s1006_s3 + $0x10] sm:$0xff] }
  0xc7   : > { %v264_v26 = vmul.f32 0.00390625, %v256_v22  ;;  %v297_v33 = vsel %vm296_vm0, %v292_v25, 0.0 }
  0xc8   : > { %v340_v46 = vsel %vm296_vm0, %v336_v34, 0.0 }
  0xc9   : > { %v262_v27 = vpop.xlane.xlu1 %261  ;;  %v293_v28 = vmul.f32 %v280_v23, %v264_v26 }
  0xca   : > { %v266_v31 = vmul.f32 0.00390625, %v262_v27  ;;  %v272_v32 = vpop.xlane.xlu0 %271 }
  0xcb   : > { %v298_v35 = vsel %vm296_vm0, %v293_v28, 0.0  ;;  %v337_v36 = vmul.f32 %v280_v23, %v272_v32  ;;  %v287_v28 = vld [vmem:[%s1006_s3 + $0x18] sm:$0xff] }
  0xcc   : > { %v299_v37 = vadd.f32 %v298_v35, %v297_v33  ;;  %v295_v38 = vmul.f32 %v282_v30, %v266_v31 }
  0xcd   : > { %v341_v39 = vsel %vm296_vm0, %v337_v36, 0.0  ;;  %v278_v41 = vpop.xlane.xlu1 %277 }
  0xce   : > { %v301_v42 = vadd.f32 %v300_v40, %v299_v37  ;;  %v275_v43 = vpop.xlane.xlu0 %274  ;;  %v302_v44 = vsel %vm296_vm0, %v295_v38, 0.0  ;;  %v339_v45 = vmul.f32 %v282_v30, %v278_v41  ;;  %v342_v48 = vadd.f32 %v341_v39, %v340_v46 }
  0xcf   : > { %v338_v47 = vmul.f32 %v281_v24, %v275_v43  ;;  %v716_v40 = vmov 0   ;;  %v289_v43 = vld [vmem:[%s1007_s4 + $0x8] sm:$0xff] }
  0xd0   : > { %v303_v49 = vadd.f32 %v302_v44, %v301_v42  ;;  %v345_v51 = vsel %vm296_vm0, %v339_v45, 0.0  ;;  %602 = vset.pattern.permute.xlu1 %v716_v40  ;;  %601 = vset.pattern.permute.xlu0 %v716_v40  ;;  %v288_v44 = vld [vmem:[%s1007_s4] sm:$0xff] }
  0xd1   : > { %v343_v50 = vsel %vm296_vm0, %v338_v47, 0.0 }
  0xd2   : > { %v344_v52 = vadd.f32 %v343_v50, %v342_v48  ;;  %v304_v53 = vrot.slane %v303_v49, 4 }
  0xd4   : > { %v305_v54 = vadd.f32 %v304_v53, %v303_v49  ;;  %v346_v55 = vadd.f32 %v345_v51, %v344_v52 }
  0xd6   : > { %v306_v56 = vrot.slane %v305_v54, 2  ;;  %v347_v57 = vrot.slane %v346_v55, 4 }
  0xd8   : > { %v307_v58 = vadd.f32 %v306_v56, %v305_v54  ;;  %v348_v59 = vadd.f32 %v347_v57, %v346_v55  ;;  %v291_v57 = vld [vmem:[%s1007_s4 + $0x18] sm:$0xff] }
  0xda   : > { %v308_v60 = vrot.slane %v307_v58, 1  ;;  %v349_v61 = vrot.slane %v348_v59, 2 }
  0xdc   : > { %v309_v3 = vadd.f32 %v308_v60, %v307_v58  ;;  %v350_v7 = vadd.f32 %v349_v61, %v348_v59  ;;  %v290_v58 = vld [vmem:[%s1007_s4 + $0x10] sm:$0xff] }
  0xde   : > { %v351_v8 = vrot.slane %v350_v7, 1  ;;  %v310_v12 = vadd.f32 %v309_v3, %v283_v63 }
  0xe0   : > { %v352_v13 = vadd.f32 %v351_v8, %v350_v7  ;;  %v311_v16 = vmax.f32 %v310_v12, 0.0 }
  0xe2   : > { %v353_v14 = vadd.f32 %v352_v13, %v283_v63  ;;  %v315_v19 = vrot.slane %v311_v16, %v314_v15 }
  0xe4   : > { %v354_v17 = vmax.f32 %v353_v14, 0.0  ;;  %v317_v26 = vmul.f32 %v315_v19, %v285_v20  ;;  %v316_v27 = vmul.f32 %v315_v19, %v284_v21  ;;  %v319_v32 = vmul.f32 %v315_v19, %v287_v28 }
  0xe5   : > { %v318_v33 = vmul.f32 %v315_v19, %v286_v29 }
  0xe6   : > { %v358_v18 = vrot.slane %v354_v17, %v314_v15  ;;  %v323_v30 = vsel %vm296_vm0, %v317_v26, 0.0  ;;  %v320_v31 = vsel %vm296_vm0, %v316_v27, 0.0  ;;  %v329_v34 = vsel %vm296_vm0, %v319_v32, 0.0 }
  0xe7   : > { %v326_v35 = vsel %vm296_vm0, %v318_v33, 0.0 }
  0xe8   : > { %v360_v22 = vmul.f32 %v358_v18, %v285_v20  ;;  %v359_v23 = vmul.f32 %v358_v18, %v284_v21  ;;  %v362_v36 = vmul.f32 %v358_v18, %v287_v28  ;;  %v361_v37 = vmul.f32 %v358_v18, %v286_v29 }
  0xea   : > { %v366_v24 = vsel %vm296_vm0, %v360_v22, 0.0  ;;  %v363_v25 = vsel %vm296_vm0, %v359_v23, 0.0  ;;  %v372_v38 = vsel %vm296_vm0, %v362_v36, 0.0  ;;  %v369_v39 = vsel %vm296_vm0, %v361_v37, 0.0 }
  0xeb   : > { %367 = vadd.xlane.f32.xlu1 %v366_v24  ;;  %364 = vadd.xlane.f32.xlu0 %v363_v25 }
  0xef   : > { %324 = vadd.xlane.f32.xlu1 %v323_v30  ;;  %321 = vadd.xlane.f32.xlu0 %v320_v31 }
  0xf3   : > { %330 = vadd.xlane.f32.xlu1 %v329_v34  ;;  %327 = vadd.xlane.f32.xlu0 %v326_v35 }
  0xf7   : > { %373 = vadd.xlane.f32.xlu1 %v372_v38  ;;  %370 = vadd.xlane.f32.xlu0 %v369_v39 }
 0x174   : > { %v368_v41 = vpop.xlane.xlu1 %367  ;;  %v365_v42 = vpop.xlane.xlu0 %364 }
 0x175   : > { %v376_v47 = vadd.f32 %v368_v41, %v289_v43  ;;  %v375_v48 = vadd.f32 %v365_v42, %v288_v44 }
 0x178   : > { %v325_v45 = vpop.xlane.xlu1 %324  ;;  %v322_v46 = vpop.xlane.xlu0 %321 }
 0x179   : > { %v333_v49 = vadd.f32 %v325_v45, %v289_v43  ;;  %v332_v50 = vadd.f32 %v322_v46, %v288_v44 }
 0x17b   : > { %v380_v51 = vadd.f32 %v376_v47, %v333_v49  ;;  %v379_v52 = vadd.f32 %v375_v48, %v332_v50 }
 0x17c   : > { %v331_v53 = vpop.xlane.xlu1 %330  ;;  %v328_v54 = vpop.xlane.xlu0 %327 }
 0x17d   : > { %v540_v55 = vmul.f32 -1.442695, %v380_v51  ;;  %v539_v56 = vmul.f32 -1.442695, %v379_v52  ;;  %v335_v61 = vadd.f32 %v331_v53, %v291_v57  ;;  %v334_v62 = vadd.f32 %v328_v54, %v290_v58 }
 0x17f   : > { %603 = vpow2.f32 %v540_v55 }
 0x180   : > { %605 = vpow2.f32 %v539_v56  ;;  %v374_v59 = vpop.xlane.xlu1 %373  ;;  %v371_v60 = vpop.xlane.xlu0 %370 }
 0x181   : > { %v378_v63 = vadd.f32 %v374_v59, %v291_v57  ;;  %v377_v3 = vadd.f32 %v371_v60, %v290_v58 }
 0x183   : > { %v382_v7 = vadd.f32 %v378_v63, %v335_v61  ;;  %v381_v8 = vadd.f32 %v377_v3, %v334_v62 }
 0x185   : > { %v542_v9 = vmul.f32 -1.442695, %v382_v7  ;;  %v541_v12 = vmul.f32 -1.442695, %v381_v8 }
 0x187   : > { %607 = vpow2.f32 %v542_v9 }
 0x188   : > { %609 = vpow2.f32 %v541_v12 }
 0x18c   : > { %v604_v13 = vpop.eup %603 }
 0x18d   : > { %v606_v14 = vpop.eup %605  ;;  %v396_v15 = vadd.f32 1.0, %v604_v13 }
 0x18e   : > { %v395_v16 = vadd.f32 1.0, %v606_v14 }
 0x18f   : > { %611 = vrcp.f32 %v396_v15 }
 0x190   : > { %613 = vrcp.f32 %v395_v16 }
 0x194   : > { %v608_v17 = vpop.eup %607 }
 0x195   : > { %v610_v18 = vpop.eup %609  ;;  %v398_v20 = vadd.f32 1.0, %v608_v17 }
 0x196   : > { %v397_v19 = vadd.f32 1.0, %v610_v18 }
 0x198   : > { %615 = vrcp.f32 %v397_v19 }
 0x199   : > { %617 = vrcp.f32 %v398_v20 }
 0x19c   : > { %v612_v21 = vpop.eup %611 }
 0x19d   : > { %v614_v22 = vpop.eup %613  ;;  %414 = vperm.xlu1 %602, %v612_v21  }
 0x19e   : > { %409 = vperm.xlu0 %601, %v614_v22  }
 0x1a5   : > { %v616_v23 = vpop.eup %615 }
 0x1a6   : > { %419 = vperm.xlu1 %602, %v616_v23   ;;  %v618_v24 = vpop.eup %617 }
 0x1aa   : > { %424 = vperm.xlu1 %602, %v618_v24  }
 0x218   : > { %v415_v25 = vpop.permute.xlu1 %414 }
 0x219   : > { %v429_v26 = vmul.f32 %v415_v25, %v867_v5  ;;  %v430_v27 = vmul.f32 %v415_v25, %v869_v6  ;;  %v410_v28 = vpop.permute.xlu0 %409 }
 0x21a   : > { %v427_v29 = vmul.f32 %v410_v28, %v861_v2  ;;  %v428_v30 = vmul.f32 %v410_v28, %v865_v4 }
 0x21b   : > { %437 = vst [vmem:[%s242_s26 + $0x10] sm:$0xff] %v429_v26  ;;  %438 = vst [vmem:[%s242_s26 + $0x18] sm:$0xff] %v430_v27 }
 0x21c   : > { %435 = vst [vmem:[%s242_s26] sm:$0xff] %v427_v29  ;;  %436 = vst [vmem:[%s242_s26 + $0x8] sm:$0xff] %v428_v30 }
 0x221   : > { %v420_v31 = vpop.permute.xlu1 %419 }
 0x222   : > { %v431_v32 = vmul.f32 %v420_v31, %v857_v0  ;;  %v432_v5 = vmul.f32 %v420_v31, %v859_v1 }
 0x224   : > { %439 = vst [vmem:[%s242_s26 + $0x20] sm:$0xff] %v431_v32  ;;  %440 = vst [vmem:[%s242_s26 + $0x28] sm:$0xff] %v432_v5 }
 0x225   : > { %v425_v2 = vpop.permute.xlu1 %424 }
 0x226   : > { %v433_v4 = vmul.f32 %v425_v2, %v877_v10  ;;  %v434_v0 = vmul.f32 %v425_v2, %v879_v11 }
 0x228   : > { %441 = vst [vmem:[%s242_s26 + $0x30] sm:$0xff] %v433_v4  ;;  %442 = vst [vmem:[%s242_s26 + $0x38] sm:$0xff] %v434_v0 }
 0x229   : > { %660 = shalt.err (!%p657_p10)
}
 0x22a   : > { %s661_s9 = scalar_lea.hbm %s958_s14, 1024  ;;  %s665_s13 = scalar_lea.hbm %s1008_s5, 2048 }
 0x22b   : > { %p662_p0 = scmp.ne.s32.totalorder %s958_s14, %s661_s9  ;;  %p666_p1 = scmp.lt.s32.totalorder %s958_s14, %s1008_s5 }
 0x22c   : > { %p667_p3 = scmp.lt.s32.totalorder %s665_s13, %s661_s9 }
 0x22d   : > { %p663_p2 = pnand %p662_p0, %p1017_p12 }
 0x22e   : > { %p668_p6 = por %p667_p3, %p666_p1 }
 0x22f   : > { %p664_p9 = pneg %p663_p2 }
 0x231   : > { %p669_p11 = pnand %p668_p6, %p664_p9 }
 0x233   : > { %672 = shalt.err (!%p669_p11)
}
 0x234   : > { %s718_s29 = smov 256   ;;  %s719_s25 = smov 16  }
 0x235   : > { %552 = dma.vmem_to_hbm [thread:$0]  (%p1017_p12), %s953_s28, 1024, %s958_s14, %s444_s22, %s718_s29, %s718_s29, %s719_s25  }
 0x236 PF: > { %s472_s12 = sand.u32 1, %s699_s18   ;;  %p1018_p13 = scmp.ne.s32.totalorder %s1014_s6, 0 }
 0x237   : > { %p1019_p4 = scmp.ge.s32.totalorder %s711_s21, 2  ;;  %s473_s15 = scalar_lea.sflag [#allocation4], %s472_s12 }
 0x239   : > { %p559_p5 = pnand %p1019_p4, %p1018_p13 }
 0x23b   : > { %p560_p7 = pneg %p559_p5 }
 0x23d   : > { %694 = dma.done.wait (%p560_p7), %s473_s15, 1024  }
 0x23e   : > { %696 = vsyncadd (%p560_p7), %s473_s15, 4294966272  ;;  %p18_p8 = scmp.ge.s32.totalorder %s775_s24, 4   ;;  %s1020_s18 = smov %s703_s19 }
 0x23f   : > { %s1021_s19 = smov %s707_s20  ;;  %s1022_s20 = smov %s787_s27 }
 0x240   : > { %s1023_s21 = smov %s775_s24  ;;  %20 = sbr.rel (!%p18_p8) target bundleno = 5 (0x5), region = 85 }
 0x245   :  { %478 = vsyncpa [#allocation3], 1 }
 0x246   :  { %480 = vsyncpa [#allocation3 + $0x1], 1 }
 0x247   :  { %481 = vsyncpa [#allocation4], 1 }
 0x248   :  { %483 = vsyncpa [#allocation4 + $0x1], 1 }

</bundles_post_ra>
